<compile_context>
chip_gen: v7x
topology: tpu7x:2x2x1
jax: 0.10.0
libtpu: 0.0.40
codegen_flags: <defaults>
</compile_context>

<pallas_src>
import jax
import jax.numpy as jnp
from jax.experimental import pallas as pl
from jax.experimental.pallas import tpu as pltpu


def _mish_kernel(x_ref, o_ref):
    x = x_ref[...].astype(jnp.float32)
    # tanh(softplus(x)) == e*(e+2) / (e*(e+2) + 2), e = exp(x).
    # Clamp before exp so e*(e+2) cannot overflow; for x > 20, mish(x) == x.
    e = jnp.exp(jnp.minimum(x, 20.0))
    num = e * (e + 2.0)
    y = x * (num / (num + 2.0))
    y = jnp.where(x > 20.0, x, y)
    o_ref[...] = y.astype(o_ref.dtype)


def _mish_jnp(x):
    # Numerically-stable pure-jnp path. Used as reference and as the fallback
    # for awkward / tiny sizes (fused XLA elementwise is at the HBM roofline
    # there, with zero extra copies).
    x32 = x.astype(jnp.float32)
    sp = jnp.maximum(x32, 0.0) + jnp.log1p(jnp.exp(-jnp.abs(x32)))
    return (x32 * jnp.tanh(sp)).astype(x.dtype)


_LANE_CANDIDATES = (2048, 1024, 512, 256, 128)


def mish(x: jax.Array, *, target_block_bytes: int = 4 * 1024 * 1024) -> jax.Array:
    """Elementwise Mish: x * tanh(softplus(x)). Matches torch semantics/dtype."""
    orig_shape = x.shape
    orig_dtype = x.dtype
    n = x.size
    itemsize = jnp.dtype(orig_dtype).itemsize

    # Sublane packing: f32 rows align to 8, bf16/f16 to 16, int8/fp8 to 32.
    row_align = {4: 8, 2: 16, 1: 32}.get(itemsize, 8)

    # Awkward (n % 128 != 0) or tiny tensors: zero-copy jnp fallback instead of
    # pad + kernel + slice (each of which is a full-array HBM read+write).
    if n == 0 or n % 128 != 0 or n < row_align * 128:
        return _mish_jnp(x)

    # Widest lane count dividing n that still fills at least one sublane group
    # of rows (avoids 1-of-8-sublane vregs; output last dim stays a large
    # multiple of 128 -> unmasked vst).
    lanes = 128
    for cand in _LANE_CANDIDATES:
        if n % cand == 0 and (n // cand) >= row_align:
            lanes = cand
            break
    rows = n // lanes
    x2d = x.reshape(rows, lanes)  # contiguous reshape: free

    # Rows per block from the byte budget (~4 MiB in-block => ~16 MiB in+out
    # double-buffered: v7x-safe, above the roofline knee on v5e/v6e).
    budget_tr = max(
        row_align,
        (target_block_bytes // (lanes * itemsize)) // row_align * row_align,
    )
    nb = pl.cdiv(rows, budget_tr)
    if nb == 1:
        # Give both v7x TensorCores a block when there are enough rows.
        nb = 2 if rows >= 2 * row_align else 1
    elif nb % 2 == 1:
        nb += 1  # best-effort even block count for a balanced megacore split
    if nb == 1:
        tr = rows  # single full-extent block (no alignment requirement)
    else:
        tr = pl.cdiv(pl.cdiv(rows, nb), row_align) * row_align
    nb = pl.cdiv(rows, tr)  # Pallas masks the ragged last block, if any

    block_bytes = tr * lanes * itemsize
    # in + out, double-buffered, plus headroom; capped at 48 MiB so it always
    # fits v7x's 64 MiB VMEM per TC (v5e/v6e have 128 MiB physical).
    vmem_limit = min(48 * 1024 * 1024, max(32 * 1024 * 1024, 6 * block_bytes))

    out2d = pl.pallas_call(
        _mish_kernel,
        out_shape=jax.ShapeDtypeStruct((rows, lanes), orig_dtype),
        grid_spec=pltpu.PrefetchScalarGridSpec(
            num_scalar_prefetch=0,
            grid=(nb,),
            in_specs=[pl.BlockSpec((tr, lanes), lambda i: (i, 0))],
            out_specs=pl.BlockSpec((tr, lanes), lambda i: (i, 0)),
        ),
        compiler_params=pltpu.CompilerParams(
            dimension_semantics=("parallel",),
            vmem_limit_bytes=vmem_limit,
        ),
        cost_estimate=pl.CostEstimate(
            flops=6 * n,
            transcendentals=n,
            bytes_accessed=2 * n * itemsize,
        ),
    )(x2d)

    return out2d.reshape(orig_shape)  # contiguous reshape: free


if __name__ == "__main__":
    key = jax.random.PRNGKey(0)
    k1, k2, k3 = jax.random.split(key, 3)

    # 1) Spec-sized NCHW activation: batch=2, channels=4, spatial=16x16.
    #    (Pallas path: lanes=256, rows=8, single block.)
    x = jax.random.normal(k1, (2, 4, 16, 16), dtype=jnp.float32) * 3.0
    y = mish(x)
    jax.block_until_ready(y)
    assert y.shape == x.shape and y.dtype == x.dtype
    assert jnp.allclose(y, _mish_jnp(x), atol=1e-5, rtol=1e-5)

    # 2) Larger tensor with extreme values: multi-block grid (v7x 2-TC split)
    #    and the large-x overflow / passthrough guard.
    xb = jax.random.normal(k2, (8, 32, 64, 64), dtype=jnp.float32) * 12.0
    yb = mish(xb)
    jax.block_until_ready(yb)
    assert jnp.allclose(yb, _mish_jnp(xb), atol=1e-5, rtol=1e-5)

    # 3) bf16 input: exercises dtype-aware sublane alignment (rows align to 16).
    xh = (jax.random.normal(k3, (4, 16, 32, 32), dtype=jnp.float32) * 3.0).astype(
        jnp.bfloat16
    )
    yh = mish(xh)
    jax.block_until_ready(yh)
    assert yh.dtype == jnp.bfloat16
    assert jnp.allclose(
        yh.astype(jnp.float32), _mish_jnp(xh).astype(jnp.float32),
        atol=1e-2, rtol=2e-2,
    )

    # 4) Awkward element count (3*5*7*11): zero-copy jnp fallback, no pad/slice.
    xa = jnp.linspace(-30.0, 30.0, 3 * 5 * 7 * 11, dtype=jnp.float32).reshape(3, 5, 7, 11)
    ya = mish(xa)
    jax.block_until_ready(ya)
    assert jnp.allclose(ya, _mish_jnp(xa), atol=1e-5, rtol=1e-5)

    print("KERNEL_OK")
</pallas_src>

<mosaic_0001>
module attributes {stable_mosaic.version = 11 : i64} {
  func.func @_mish_kernel(%arg0: i32, %arg1: memref<8x256xf32, #tpu.memory_space<vmem>>, %arg2: memref<8x256xf32, #tpu.memory_space<vmem>>) attributes {dimension_semantics = [#tpu.dimension_semantics<parallel>], iteration_bounds = array<i64: 1>, scalar_prefetch = 0 : i64, scratch_operands = 0 : i64, tpu.core_type = #tpu.core_type<tc>, window_params = [{transform_indices = @transform_0, window_bounds = array<i64: 8, 256>}, {transform_indices = @transform_1, window_bounds = array<i64: 8, 256>}]} {
    %c0 = arith.constant 0 : index
    %c0_0 = arith.constant 0 : index
    %0 = vector.load %arg1[%c0, %c0_0] : memref<8x256xf32, #tpu.memory_space<vmem>>, vector<8x256xf32>
    %cst = arith.constant 2.000000e+01 : f32
    %1 = vector.broadcast %cst : f32 to vector<8x256xf32>
    %2 = arith.minimumf %0, %1 : vector<8x256xf32>
    %3 = math.exp %2 : vector<8x256xf32>
    %cst_1 = arith.constant 2.000000e+00 : f32
    %4 = vector.broadcast %cst_1 : f32 to vector<8x256xf32>
    %5 = arith.addf %3, %4 : vector<8x256xf32>
    %6 = arith.mulf %3, %5 : vector<8x256xf32>
    %cst_2 = arith.constant 2.000000e+00 : f32
    %7 = vector.broadcast %cst_2 : f32 to vector<8x256xf32>
    %8 = arith.addf %6, %7 : vector<8x256xf32>
    %9 = arith.divf %6, %8 : vector<8x256xf32>
    %10 = arith.mulf %0, %9 : vector<8x256xf32>
    %cst_3 = arith.constant 2.000000e+01 : f32
    %11 = vector.broadcast %cst_3 : f32 to vector<8x256xf32>
    %12 = arith.cmpf ogt, %0, %11 : vector<8x256xf32>
    %13 = arith.select %12, %0, %10 : vector<8x256xi1>, vector<8x256xf32>
    %c0_4 = arith.constant 0 : index
    %c0_5 = arith.constant 0 : index
    %14 = vector.load %arg2[%c0_4, %c0_5] : memref<8x256xf32, #tpu.memory_space<vmem>>, vector<8x256xf32>
    tpu.vector_store %arg2[%c0_4, %c0_5], %13 {strides = array<i32>} : memref<8x256xf32, #tpu.memory_space<vmem>>, vector<8x256xf32>,
    return
  }
  func.func @transform_0(%arg0: i32) -> (i32, i32) {
    %c0_i32 = arith.constant 0 : i32
    %c0_i32_0 = arith.constant 0 : i32
    return %arg0, %c0_i32 : i32, i32
  }
  func.func @transform_1(%arg0: i32) -> (i32, i32) {
    %c0_i32 = arith.constant 0 : i32
    %c0_i32_0 = arith.constant 0 : i32
    return %arg0, %c0_i32 : i32, i32
  }
}

</mosaic_0001>

<bundles_post_ra>
// kernel: tpu_custom_call.1
= control target key start
LH: loop header
LB: loop body
LE: loop exit
PB: predicated region body
PF: predicated region fallthrough
CT: control target
= control target key end

     0   :  { %6 = vsyncpa [#allocation3], 0  ;;  %s156_s0 = inlined_call_operand.hbm [shape: f32[8,256], index: 0, kind: input, shape index: {}]   ;;  %s157_s1 = inlined_call_operand.hbm [shape: f32[8,256], index: 1, kind: output, shape index: {}]  }
   0x1   :  { %7 = vsyncpa [#allocation4], 0  ;;  %s120_s6 = smov [#allocation2]   ;;  %s72_s10 = scalar_lea.hbm %s156_s0, 256 }
   0x2   :  { %s14_s7 = sshll.u32 %s120_s6, 4  ;;  %p73_p0 = scmp.ne.s32.totalorder %s156_s0, %s72_s10  ;;  %s15_s7 = int_to_ptr.vmem [resolvable:$true] %s14_s7 }
   0x3   :  { %p76_p1 = scmp.lt.u32.totalorder %s72_s10, %s156_s0 }
   0x5   :  { %p78_p2 = pnand %p76_p1, %p73_p0 }
   0x7   :  { %81 = shalt.err (!%p78_p2)
}
   0x8   :  { %s82_s15 = scalar_lea.vmem %s15_s7, 256  ;;  %p87_p4 = scmp.lt.s32.totalorder %s15_s7, %s15_s7 }
   0x9   :  { %p83_p3 = scmp.ne.s32.totalorder %s15_s7, %s82_s15  ;;  %p88_p5 = scmp.lt.s32.totalorder %s82_s15, %s82_s15 }
   0xb   :  { %p89_p6 = por %p88_p5, %p87_p4 }
   0xd   :  { %p90_p7 = pnand %p89_p6, %p83_p3 }
   0xf   :  { %93 = shalt.err (!%p90_p7)
}
  0x10   :  { %17 = dma.hbm_to_vmem [thread:$0]  %s156_s0, 256, %s15_s7, [#allocation3]  }
  0x11   :  { %116 = dma.done.wait [#allocation3], 256  }
  0x12   :  { %117 = vsyncadd [#allocation3], 4294967040  ;;  %v21_v0 = vld [vmem:[#allocation2] sm:$0xff]  ;;  %v22_v1 = vld [vmem:[#allocation2 + $0x8] sm:$0xff]  ;;  %s121_s0 = smov [#allocation5]  }
  0x13   :  { %v23_v2 = vmin.f32 %v21_v0, 20.0  ;;  %v24_v3 = vmin.f32 %v22_v1, 20.0  ;;  %vm41_vm0 = vcmp.gt.f32.partialorder %v21_v0, 20.0  ;;  %s53_s18 = sshll.u32 %s121_s0, 4  ;;  %vm42_vm1 = vcmp.gt.f32.partialorder %v22_v1, 20.0  ;;  %s54_s18 = int_to_ptr.vmem [resolvable:$true] %s53_s18 }
  0x14   :  { %s94_s19 = scalar_lea.vmem %s54_s18, 256  ;;  %p99_p9 = scmp.lt.s32.totalorder %s54_s18, %s54_s18 }
  0x15   :  { %v25_v4 = vmul.f32 1.442695, %v23_v2  ;;  %v27_v5 = vmul.f32 1.442695, %v24_v3  ;;  %p95_p8 = scmp.ne.s32.totalorder %s54_s18, %s94_s19  ;;  %p100_p10 = scmp.lt.s32.totalorder %s94_s19, %s94_s19 }
  0x17   :  { %64 = vpow2.f32 %v25_v4  ;;  %p101_p11 = por %p100_p10, %p99_p9 }
  0x18   :  { %66 = vpow2.f32 %v27_v5 }
  0x19   :  { %p102_p12 = pnand %p101_p11, %p95_p8 }
  0x21   :  { %v65_v6 = vpop.eup %64 }
  0x22   :  { %v67_v7 = vpop.eup %66  ;;  %v29_v8 = vadd.f32 2.0, %v65_v6 }
  0x23   :  { %v30_v9 = vadd.f32 2.0, %v67_v7 }
  0x24   :  { %v31_v10 = vmul.f32 %v65_v6, %v29_v8 }
  0x25   :  { %v32_v11 = vmul.f32 %v67_v7, %v30_v9 }
  0x26   :  { %v33_v12 = vadd.f32 2.0, %v31_v10 }
  0x27   :  { %v34_v13 = vadd.f32 2.0, %v32_v11 }
  0x28   :  { %68 = vrcp.f32 %v33_v12 }
  0x29   :  { %70 = vrcp.f32 %v34_v13 }
  0x32   :  { %v69_v14 = vpop.eup %68 }
  0x33   :  { %v71_v15 = vpop.eup %70  ;;  %v36_v16 = vmul.f32 %v69_v14, %v31_v10 }
  0x34   :  { %v38_v17 = vmul.f32 %v71_v15, %v32_v11 }
  0x35   :  { %v39_v18 = vmul.f32 %v36_v16, %v21_v0 }
  0x36   :  { %v40_v19 = vmul.f32 %v38_v17, %v22_v1 }
  0x37   :  { %v43_v20 = vsel %vm41_vm0, %v21_v0, %v39_v18 }
  0x38   :  { %45 = vst [vmem:[#allocation5] sm:$0xff] %v43_v20  ;;  %v44_v21 = vsel %vm42_vm1, %v22_v1, %v40_v19 }
  0x39   :  { %46 = vst [vmem:[#allocation5 + $0x8] sm:$0xff] %v44_v21 }
  0x3a   :  { %105 = shalt.err (!%p102_p12)
}
  0x3b   :  { %s106_s22 = scalar_lea.hbm %s157_s1, 256 }
  0x3c   :  { %p107_p13 = scmp.ne.s32.totalorder %s157_s1, %s106_s22  ;;  %p110_p0 = scmp.lt.u32.totalorder %s106_s22, %s157_s1 }
  0x3e   :  { %p112_p1 = pnand %p110_p0, %p107_p13 }
  0x40   :  { %115 = shalt.err (!%p112_p1)
}
  0x41   :  { %56 = dma.vmem_to_hbm [thread:$0]  %s54_s18, 256, %s157_s1, [#allocation4]  }
  0x42   :  { %118 = dma.done.wait [#allocation4], 256  }
  0x43   :  { %119 = vsyncadd [#allocation4], 4294967040 }
  0x44   :  { %60 = vsyncpa [#allocation3], 1 }
  0x45   :  { %61 = vsyncpa [#allocation4], 1 }

</bundles_post_ra>
